<compile_context>
chip_gen: v7x
topology: tpu7x:2x2x1
jax: 0.10.0
libtpu: 0.0.40
codegen_flags: <defaults>
</compile_context>

<pallas_src>
import itertools
from functools import partial

import numpy as np
import jax
import jax.numpy as jnp
from jax.experimental import pallas as pl
from jax.experimental.pallas import tpu as pltpu


def _round_up(x: int, m: int) -> int:
    return ((x + m - 1) // m) * m


# ----------------------------------------------------------------------------
# Pallas kernel: fused focal class cost + L1 box cost + (-GIoU) cost
# ----------------------------------------------------------------------------
def _matcher_cost_kernel(logits_ref, pred_aux_ref, onehot_ref, tgt_aux_ref,
                         c_ref, *, cost_class_w, cost_giou_w, focal_alpha):
    # ---- class cost: gather logits at tgt_ids on the MXU (bf16 in, f32 acc),
    # then do the focal transform on the small [TILE_N, M_pad] tile using the
    # log identity (1 exp + 1 log + 1 recip per element).
    x = jnp.dot(logits_ref[...], onehot_ref[...],
                preferred_element_type=jnp.float32)              # [T, M]
    e = jnp.exp(-x)
    inv1pe = pl.reciprocal(1.0 + e, approx=True)                 # prob = sigmoid(x)
    log1pe = jnp.log(1.0 + e)                                    # -log(prob)
    prob = inv1pe
    one_m_prob = e * inv1pe                                      # 1 - prob
    pos_w = cost_class_w * focal_alpha                           # fold class weight
    neg_w = cost_class_w * (1.0 - focal_alpha)
    # pos = alpha*(1-p)^2 * -log(p);  neg = (1-alpha)*p^2 * -log(1-p) = p^2*(x + log1pe)
    cost_class = (pos_w * (one_m_prob * one_m_prob) * log1pe
                  - neg_w * (prob * prob) * (x + log1pe))

    pa = pred_aux_ref[...]        # [T, 8]: wb*cx, wb*cy, wb*w, wb*h, x0, y0, x1, y1
    ta = tgt_aux_ref[...]         # [8, M]: wb*cx, wb*cy, wb*w, wb*h, x0, y0, x1, y1

    # ---- L1 cdist over the cxcywh coordinates (pre-scaled by cost_bbox in XLA)
    l1 = jnp.abs(pa[:, 0:1] - ta[0:1, :])
    for k in range(1, 4):
        l1 = l1 + jnp.abs(pa[:, k:k + 1] - ta[k:k + 1, :])

    # ---- GIoU cost: [T,1] x [1,M] operands, implicit broadcasting (no
    # materialized [T,M] coordinate temporaries).
    o_x0 = pa[:, 4:5]
    o_y0 = pa[:, 5:6]
    o_x1 = pa[:, 6:7]
    o_y1 = pa[:, 7:8]
    t_x0 = ta[4:5, :]
    t_y0 = ta[5:6, :]
    t_x1 = ta[6:7, :]
    t_y1 = ta[7:8, :]

    area1 = (o_x1 - o_x0) * (o_y1 - o_y0)    # [T, 1]
    area2 = (t_x1 - t_x0) * (t_y1 - t_y0)    # [1, M]

    iw = jnp.maximum(jnp.minimum(o_x1, t_x1) - jnp.maximum(o_x0, t_x0), 0.0)
    ih = jnp.maximum(jnp.minimum(o_y1, t_y1) - jnp.maximum(o_y0, t_y0), 0.0)
    inter = iw * ih
    union = area1 + area2 - inter
    iou = inter * pl.reciprocal(union, approx=True)

    # enclosing-box extents are non-negative by construction -> no clamp
    ew = jnp.maximum(o_x1, t_x1) - jnp.minimum(o_x0, t_x0)
    eh = jnp.maximum(o_y1, t_y1) - jnp.minimum(o_y0, t_y0)
    earea = ew * eh
    giou = iou - (earea - union) * pl.reciprocal(earea, approx=True)

    c_ref[...] = (l1 + cost_class - cost_giou_w * giou).astype(c_ref.dtype)


# ----------------------------------------------------------------------------
# Wrapper: padding, aux construction (in XLA), grid + BlockSpecs
# ----------------------------------------------------------------------------
@partial(jax.jit,
         static_argnames=("cost_class", "cost_bbox", "cost_giou",
                          "focal_alpha", "tile_n"))
def matcher_cost_matrix(pred_logits, pred_boxes, tgt_ids, tgt_bbox, *,
                        cost_class=2.0, cost_bbox=5.0, cost_giou=2.0,
                        focal_alpha=0.25, tile_n=512):
    """Returns the DETR matching cost matrix C of shape [bs, num_queries, M]."""
    bs, nq, ncls = pred_logits.shape
    n = bs * nq
    m = tgt_bbox.shape[0]

    # --- padding / tiling choices
    # lane-dense classes for realistic counts (e.g. 91 -> 128); 16 for tiny demos
    c_pad = _round_up(ncls, 16) if ncls <= 64 else _round_up(ncls, 128)
    m_pad = _round_up(m, 128)            # lane-dense output & MXU result width

    # VMEM-aware tile: budget the live [tile, m_pad] f32 temporaries plus the
    # double-buffered output/inputs; keep per-step scratch under ~16 MiB so we
    # stay inside v5e's default scoped VMEM and well inside v7x's 64 MiB.
    bytes_per_row = m_pad * 4 * 14 + c_pad * 2 * 2 + 8 * 4 * 2
    vmem_budget = 16 * 1024 * 1024
    tile_cap = max(16, (vmem_budget // bytes_per_row) // 16 * 16)
    tile = min(int(tile_n), tile_cap, _round_up(n, 16))
    if n >= 32:
        # guarantee >= 2 grid steps (ideally 4) so both v7x TensorCores get work
        tile = min(tile, max(16, _round_up(-(-n // 4), 16)))
    tile = max(16, _round_up(tile, 16))
    n_pad = _round_up(n, tile)
    grid = (n_pad // tile,)

    # --- operands built in XLA (O(N)+O(M) work, fuses for free)
    logits = pred_logits.reshape(n, ncls).astype(jnp.bfloat16)
    logits = jnp.pad(logits, ((0, n_pad - n), (0, c_pad - ncls)))

    wb = jnp.float32(cost_bbox)          # fold L1 weight into the coords
    ob = pred_boxes.reshape(n, 4).astype(jnp.float32)
    cx, cy, w, h = ob[:, 0], ob[:, 1], ob[:, 2], ob[:, 3]
    pred_aux = jnp.stack([wb * cx, wb * cy, wb * w, wb * h,
                          cx - 0.5 * w, cy - 0.5 * h,
                          cx + 0.5 * w, cy + 0.5 * h], axis=-1)       # [n, 8]
    pred_aux = jnp.pad(pred_aux, ((0, n_pad - n), (0, 0)))

    onehot = jax.nn.one_hot(tgt_ids, c_pad, dtype=jnp.bfloat16).T     # [c_pad, m]
    onehot = jnp.pad(onehot, ((0, 0), (0, m_pad - m)))

    tb = tgt_bbox.astype(jnp.float32)
    tcx, tcy, tw, th = tb[:, 0], tb[:, 1], tb[:, 2], tb[:, 3]
    tgt_aux = jnp.stack([wb * tcx, wb * tcy, wb * tw, wb * th,
                         tcx - 0.5 * tw, tcy - 0.5 * th,
                         tcx + 0.5 * tw, tcy + 0.5 * th], axis=0)     # [8, m]
    tgt_aux = jnp.pad(tgt_aux, ((0, 0), (0, m_pad - m)))

    kernel = partial(_matcher_cost_kernel,
                     cost_class_w=float(cost_class),
                     cost_giou_w=float(cost_giou),
                     focal_alpha=float(focal_alpha))

    cost_estimate = pl.CostEstimate(
        flops=2 * n_pad * c_pad * m_pad + 40 * n_pad * m_pad,
        transcendentals=5 * n_pad * m_pad,
        bytes_accessed=(n_pad * c_pad * 2 + c_pad * m_pad * 2
                        + n_pad * 8 * 4 + 8 * m_pad * 4
                        + n_pad * m_pad * 4),
    )

    # NOTE: the constant-index operands (onehot, tgt_aux) could be marked
    # pipeline_mode=pl.Buffered(1) to save one buffer copy of VMEM; left at the
    # default double-buffering here since they are small (<= c_pad*m_pad*2 B).
    c = pl.pallas_call(
        kernel,
        out_shape=jax.ShapeDtypeStruct((n_pad, m_pad), jnp.float32),
        grid=grid,
        in_specs=[
            pl.BlockSpec((tile, c_pad), lambda i: (i, 0)),    # logits (bf16)
            pl.BlockSpec((tile, 8), lambda i: (i, 0)),        # pred aux (f32)
            pl.BlockSpec((c_pad, m_pad), lambda i: (0, 0)),   # one-hot (bf16)
            pl.BlockSpec((8, m_pad), lambda i: (0, 0)),       # tgt aux (f32)
        ],
        out_specs=pl.BlockSpec((tile, m_pad), lambda i: (i, 0)),
        compiler_params=pltpu.CompilerParams(
            dimension_semantics=("parallel",),
            vmem_limit_bytes=32 * 1024 * 1024),
        cost_estimate=cost_estimate,
    )(logits, pred_aux, onehot, tgt_aux)

    return c[:n, :m].reshape(bs, nq, m)


# ----------------------------------------------------------------------------
# Host-side glue: exact assignment (brute force; fine for small target counts)
# ----------------------------------------------------------------------------
# TODO(synk): scipy.optimize.linear_sum_assignment (Hungarian algorithm) is a
# sequential combinatorial algorithm with no clean Pallas equivalent; the
# optimal assignment is computed on host instead.
def _linear_sum_assignment_bruteforce(c):
    c = np.asarray(c)
    r, k = c.shape
    assert k <= r, "expected num_queries >= num_targets for this demo"
    best_cost, best_rows = None, None
    for rows in itertools.permutations(range(r), k):
        cost = sum(c[rows[j], j] for j in range(k))
        if best_cost is None or cost < best_cost:
            best_cost, best_rows = cost, rows
    pairs = sorted(zip(best_rows, range(k)))
    i = np.array([p[0] for p in pairs], dtype=np.int64)
    j = np.array([p[1] for p in pairs], dtype=np.int64)
    return i, j


def hungarian_matcher_forward(outputs, targets, **cost_kwargs):
    tgt_ids = jnp.concatenate([t["labels"] for t in targets])
    tgt_bbox = jnp.concatenate([t["boxes"] for t in targets])
    C = matcher_cost_matrix(outputs["pred_logits"], outputs["pred_boxes"],
                            tgt_ids, tgt_bbox, **cost_kwargs)
    C = np.asarray(jax.block_until_ready(C))
    sizes = [int(t["boxes"].shape[0]) for t in targets]
    indices, off = [], 0
    for b, s in enumerate(sizes):
        indices.append(_linear_sum_assignment_bruteforce(C[b, :, off:off + s]))
        off += s
    return indices, C


# ----------------------------------------------------------------------------
# Pure-numpy reference of the cost matrix (for validation)
# ----------------------------------------------------------------------------
def _cost_ref_np(pred_logits, pred_boxes, tgt_ids, tgt_bbox,
                 cost_class=2.0, cost_bbox=5.0, cost_giou=2.0, alpha=0.25):
    bs, nq, _ = pred_logits.shape
    out_prob = 1.0 / (1.0 + np.exp(-pred_logits.reshape(bs * nq, -1)))
    out_bbox = pred_boxes.reshape(bs * nq, 4)
    neg = (1 - alpha) * out_prob ** 2 * -np.log(1 - out_prob + 1e-8)
    pos = alpha * (1 - out_prob) ** 2 * -np.log(out_prob + 1e-8)
    cls = pos[:, tgt_ids] - neg[:, tgt_ids]
    l1 = np.abs(out_bbox[:, None, :] - tgt_bbox[None, :, :]).sum(-1)

    def to_xyxy(b):
        cx, cy, w, h = b[:, 0], b[:, 1], b[:, 2], b[:, 3]
        return np.stack([cx - w / 2, cy - h / 2, cx + w / 2, cy + h / 2], -1)

    b1, b2 = to_xyxy(out_bbox), to_xyxy(tgt_bbox)
    a1 = (b1[:, 2] - b1[:, 0]) * (b1[:, 3] - b1[:, 1])
    a2 = (b2[:, 2] - b2[:, 0]) * (b2[:, 3] - b2[:, 1])
    lt = np.maximum(b1[:, None, :2], b2[None, :, :2])
    rb = np.minimum(b1[:, None, 2:], b2[None, :, 2:])
    wh = np.clip(rb - lt, 0, None)
    inter = wh[..., 0] * wh[..., 1]
    union = a1[:, None] + a2[None, :] - inter
    iou = inter / union
    elt = np.minimum(b1[:, None, :2], b2[None, :, :2])
    erb = np.maximum(b1[:, None, 2:], b2[None, :, 2:])
    ewh = np.clip(erb - elt, 0, None)
    earea = ewh[..., 0] * ewh[..., 1]
    giou = iou - (earea - union) / earea
    C = cost_bbox * l1 + cost_class * cls + cost_giou * (-giou)
    return C.reshape(bs, nq, -1)


if __name__ == "__main__":
    bs, nq, ncls = 2, 16, 8
    sizes = [3, 2]

    key = jax.random.PRNGKey(0)
    k1, k2, k3, k4, k5 = jax.random.split(key, 5)

    pred_logits = jax.random.normal(k1, (bs, nq, ncls), dtype=jnp.float32)
    pred_boxes = jax.nn.sigmoid(jax.random.normal(k2, (bs, nq, 4),
                                                  dtype=jnp.float32))
    labels = jax.random.randint(k3, (sum(sizes),), 0, ncls)
    cxcy = jax.random.uniform(k4, (sum(sizes), 2), minval=0.2, maxval=0.8)
    wh = jax.random.uniform(k5, (sum(sizes), 2), minval=0.05, maxval=0.3)
    boxes = jnp.concatenate([cxcy, wh], axis=-1).astype(jnp.float32)

    targets = []
    off = 0
    for s in sizes:
        targets.append({"labels": labels[off:off + s], "boxes": boxes[off:off + s]})
        off += s
    outputs = {"pred_logits": pred_logits, "pred_boxes": pred_boxes}

    # Default tiling: N = 32 -> tile 16, 2-step grid (exercises the pipeline
    # path and the v7x megacore split).
    indices, C = hungarian_matcher_forward(outputs, targets)

    # Validate cost matrix against numpy reference; the reference uses the same
    # bf16-quantized logits that feed the MXU gather (the only lossy input
    # step).  Tolerance allows for the approx-reciprocal (EUP vrcp) GIoU/prob
    # error, which is O(1e-3) on the weighted costs.
    logits_bf16 = np.asarray(pred_logits.astype(jnp.bfloat16).astype(jnp.float32))
    C_ref = _cost_ref_np(logits_bf16, np.asarray(pred_boxes),
                         np.asarray(labels), np.asarray(boxes))
    np.testing.assert_allclose(C, C_ref, rtol=1e-2, atol=1e-2)

    for (i, j), s in zip(indices, sizes):
        assert len(i) == len(j) == min(nq, s)

    print("KERNEL_OK")
</pallas_src>

<mosaic_0001>
module attributes {stable_mosaic.version = 11 : i64} {
  func.func @_matcher_cost_kernel(%arg0: i32, %arg1: memref<16x16xbf16, #tpu.memory_space<vmem>>, %arg2: memref<16x8xf32, #tpu.memory_space<vmem>>, %arg3: memref<16x128xbf16, #tpu.memory_space<vmem>>, %arg4: memref<8x128xf32, #tpu.memory_space<vmem>>, %arg5: memref<16x128xf32, #tpu.memory_space<vmem>>) attributes {dimension_semantics = [#tpu.dimension_semantics<parallel>], iteration_bounds = array<i64: 2>, scalar_prefetch = 0 : i64, scratch_operands = 0 : i64, tpu.core_type = #tpu.core_type<tc>, window_params = [{transform_indices = @transform_0, window_bounds = array<i64: 16, 16>}, {transform_indices = @transform_1, window_bounds = array<i64: 16, 8>}, {pipeline_mode = #tpu.pipeline_mode<synchronous>, transform_indices = @transform_2, window_bounds = array<i64: 16, 128>}, {pipeline_mode = #tpu.pipeline_mode<synchronous>, transform_indices = @transform_3, window_bounds = array<i64: 8, 128>}, {transform_indices = @transform_4, window_bounds = array<i64: 16, 128>}]} {
    %c0 = arith.constant 0 : index
    %c0_0 = arith.constant 0 : index
    %0 = vector.load %arg1[%c0, %c0_0] : memref<16x16xbf16, #tpu.memory_space<vmem>>, vector<16x16xbf16>
    %c0_1 = arith.constant 0 : index
    %c0_2 = arith.constant 0 : index
    %1 = vector.load %arg3[%c0_1, %c0_2] : memref<16x128xbf16, #tpu.memory_space<vmem>>, vector<16x128xbf16>
    %cst = arith.constant dense<0.000000e+00> : vector<16x128xf32>
    %2 = tpu.matmul %0, %1, %cst {dimension_numbers = #tpu.dot_dimension_numbers<[1], [0], [0], [1], [0, 0, 1, 1], [], []>} : vector<16x16xbf16>, vector<16x128xbf16>, vector<16x128xf32> -> vector<16x128xf32>
    %cst_3 = arith.constant 0.000000e+00 : f32
    %3 = vector.broadcast %cst_3 : f32 to vector<16x128xf32>
    %4 = arith.subf %3, %2 : vector<16x128xf32>
    %5 = math.exp %4 : vector<16x128xf32>
    %cst_4 = arith.constant 1.000000e+00 : f32
    %6 = vector.broadcast %cst_4 : f32 to vector<16x128xf32>
    %7 = arith.addf %6, %5 : vector<16x128xf32>
    %8 = tpu.reciprocal %7 {approx = true} : vector<16x128xf32> -> vector<16x128xf32>
    %cst_5 = arith.constant 1.000000e+00 : f32
    %9 = vector.broadcast %cst_5 : f32 to vector<16x128xf32>
    %10 = arith.addf %9, %5 : vector<16x128xf32>
    %11 = math.log %10 : vector<16x128xf32>
    %12 = arith.mulf %5, %8 : vector<16x128xf32>
    %13 = arith.mulf %12, %12 : vector<16x128xf32>
    %cst_6 = arith.constant 5.000000e-01 : f32
    %14 = vector.broadcast %cst_6 : f32 to vector<16x128xf32>
    %15 = arith.mulf %14, %13 : vector<16x128xf32>
    %16 = arith.mulf %15, %11 : vector<16x128xf32>
    %17 = arith.mulf %8, %8 : vector<16x128xf32>
    %cst_7 = arith.constant 1.500000e+00 : f32
    %18 = vector.broadcast %cst_7 : f32 to vector<16x128xf32>
    %19 = arith.mulf %18, %17 : vector<16x128xf32>
    %20 = arith.addf %2, %11 : vector<16x128xf32>
    %21 = arith.mulf %19, %20 : vector<16x128xf32>
    %22 = arith.subf %16, %21 : vector<16x128xf32>
    %c0_8 = arith.constant 0 : index
    %c0_9 = arith.constant 0 : index
    %23 = vector.load %arg2[%c0_8, %c0_9] : memref<16x8xf32, #tpu.memory_space<vmem>>, vector<16x8xf32>
    %c0_10 = arith.constant 0 : index
    %c0_11 = arith.constant 0 : index
    %24 = vector.load %arg4[%c0_10, %c0_11] : memref<8x128xf32, #tpu.memory_space<vmem>>, vector<8x128xf32>
    %25 = vector.extract_strided_slice %23 {offsets = [0, 0], sizes = [16, 1], strides = [1, 1]} : vector<16x8xf32> to vector<16x1xf32>
    %26 = vector.extract_strided_slice %24 {offsets = [0, 0], sizes = [1, 128], strides = [1, 1]} : vector<8x128xf32> to vector<1x128xf32>
    %27 = vector.broadcast %25 : vector<16x1xf32> to vector<16x128xf32>
    %28 = vector.broadcast %26 : vector<1x128xf32> to vector<16x128xf32>
    %29 = arith.subf %27, %28 : vector<16x128xf32>
    %30 = math.absf %29 : vector<16x128xf32>
    %31 = vector.extract_strided_slice %23 {offsets = [0, 1], sizes = [16, 1], strides = [1, 1]} : vector<16x8xf32> to vector<16x1xf32>
    %32 = vector.extract_strided_slice %24 {offsets = [1, 0], sizes = [1, 128], strides = [1, 1]} : vector<8x128xf32> to vector<1x128xf32>
    %33 = vector.broadcast %31 : vector<16x1xf32> to vector<16x128xf32>
    %34 = vector.broadcast %32 : vector<1x128xf32> to vector<16x128xf32>
    %35 = arith.subf %33, %34 : vector<16x128xf32>
    %36 = math.absf %35 : vector<16x128xf32>
    %37 = arith.addf %30, %36 : vector<16x128xf32>
    %38 = vector.extract_strided_slice %23 {offsets = [0, 2], sizes = [16, 1], strides = [1, 1]} : vector<16x8xf32> to vector<16x1xf32>
    %39 = vector.extract_strided_slice %24 {offsets = [2, 0], sizes = [1, 128], strides = [1, 1]} : vector<8x128xf32> to vector<1x128xf32>
    %40 = vector.broadcast %38 : vector<16x1xf32> to vector<16x128xf32>
    %41 = vector.broadcast %39 : vector<1x128xf32> to vector<16x128xf32>
    %42 = arith.subf %40, %41 : vector<16x128xf32>
    %43 = math.absf %42 : vector<16x128xf32>
    %44 = arith.addf %37, %43 : vector<16x128xf32>
    %45 = vector.extract_strided_slice %23 {offsets = [0, 3], sizes = [16, 1], strides = [1, 1]} : vector<16x8xf32> to vector<16x1xf32>
    %46 = vector.extract_strided_slice %24 {offsets = [3, 0], sizes = [1, 128], strides = [1, 1]} : vector<8x128xf32> to vector<1x128xf32>
    %47 = vector.broadcast %45 : vector<16x1xf32> to vector<16x128xf32>
    %48 = vector.broadcast %46 : vector<1x128xf32> to vector<16x128xf32>
    %49 = arith.subf %47, %48 : vector<16x128xf32>
    %50 = math.absf %49 : vector<16x128xf32>
    %51 = arith.addf %44, %50 : vector<16x128xf32>
    %52 = vector.extract_strided_slice %23 {offsets = [0, 4], sizes = [16, 1], strides = [1, 1]} : vector<16x8xf32> to vector<16x1xf32>
    %53 = vector.extract_strided_slice %23 {offsets = [0, 5], sizes = [16, 1], strides = [1, 1]} : vector<16x8xf32> to vector<16x1xf32>
    %54 = vector.extract_strided_slice %23 {offsets = [0, 6], sizes = [16, 1], strides = [1, 1]} : vector<16x8xf32> to vector<16x1xf32>
    %55 = vector.extract_strided_slice %23 {offsets = [0, 7], sizes = [16, 1], strides = [1, 1]} : vector<16x8xf32> to vector<16x1xf32>
    %56 = vector.extract_strided_slice %24 {offsets = [4, 0], sizes = [1, 128], strides = [1, 1]} : vector<8x128xf32> to vector<1x128xf32>
    %57 = vector.extract_strided_slice %24 {offsets = [5, 0], sizes = [1, 128], strides = [1, 1]} : vector<8x128xf32> to vector<1x128xf32>
    %58 = vector.extract_strided_slice %24 {offsets = [6, 0], sizes = [1, 128], strides = [1, 1]} : vector<8x128xf32> to vector<1x128xf32>
    %59 = vector.extract_strided_slice %24 {offsets = [7, 0], sizes = [1, 128], strides = [1, 1]} : vector<8x128xf32> to vector<1x128xf32>
    %60 = arith.subf %54, %52 : vector<16x1xf32>
    %61 = arith.subf %55, %53 : vector<16x1xf32>
    %62 = arith.mulf %60, %61 : vector<16x1xf32>
    %63 = arith.subf %58, %56 : vector<1x128xf32>
    %64 = arith.subf %59, %57 : vector<1x128xf32>
    %65 = arith.mulf %63, %64 : vector<1x128xf32>
    %66 = vector.broadcast %54 : vector<16x1xf32> to vector<16x128xf32>
    %67 = vector.broadcast %58 : vector<1x128xf32> to vector<16x128xf32>
    %68 = arith.minimumf %66, %67 : vector<16x128xf32>
    %69 = vector.broadcast %52 : vector<16x1xf32> to vector<16x128xf32>
    %70 = vector.broadcast %56 : vector<1x128xf32> to vector<16x128xf32>
    %71 = arith.maximumf %69, %70 : vector<16x128xf32>
    %72 = arith.subf %68, %71 : vector<16x128xf32>
    %cst_12 = arith.constant 0.000000e+00 : f32
    %73 = vector.broadcast %cst_12 : f32 to vector<16x128xf32>
    %74 = arith.maximumf %72, %73 : vector<16x128xf32>
    %75 = vector.broadcast %55 : vector<16x1xf32> to vector<16x128xf32>
    %76 = vector.broadcast %59 : vector<1x128xf32> to vector<16x128xf32>
    %77 = arith.minimumf %75, %76 : vector<16x128xf32>
    %78 = vector.broadcast %53 : vector<16x1xf32> to vector<16x128xf32>
    %79 = vector.broadcast %57 : vector<1x128xf32> to vector<16x128xf32>
    %80 = arith.maximumf %78, %79 : vector<16x128xf32>
    %81 = arith.subf %77, %80 : vector<16x128xf32>
    %cst_13 = arith.constant 0.000000e+00 : f32
    %82 = vector.broadcast %cst_13 : f32 to vector<16x128xf32>
    %83 = arith.maximumf %81, %82 : vector<16x128xf32>
    %84 = arith.mulf %74, %83 : vector<16x128xf32>
    %85 = vector.broadcast %62 : vector<16x1xf32> to vector<16x128xf32>
    %86 = vector.broadcast %65 : vector<1x128xf32> to vector<16x128xf32>
    %87 = arith.addf %85, %86 : vector<16x128xf32>
    %88 = arith.subf %87, %84 : vector<16x128xf32>
    %89 = tpu.reciprocal %88 {approx = true} : vector<16x128xf32> -> vector<16x128xf32>
    %90 = arith.mulf %84, %89 : vector<16x128xf32>
    %91 = vector.broadcast %54 : vector<16x1xf32> to vector<16x128xf32>
    %92 = vector.broadcast %58 : vector<1x128xf32> to vector<16x128xf32>
    %93 = arith.maximumf %91, %92 : vector<16x128xf32>
    %94 = vector.broadcast %52 : vector<16x1xf32> to vector<16x128xf32>
    %95 = vector.broadcast %56 : vector<1x128xf32> to vector<16x128xf32>
    %96 = arith.minimumf %94, %95 : vector<16x128xf32>
    %97 = arith.subf %93, %96 : vector<16x128xf32>
    %98 = vector.broadcast %55 : vector<16x1xf32> to vector<16x128xf32>
    %99 = vector.broadcast %59 : vector<1x128xf32> to vector<16x128xf32>
    %100 = arith.maximumf %98, %99 : vector<16x128xf32>
    %101 = vector.broadcast %53 : vector<16x1xf32> to vector<16x128xf32>
    %102 = vector.broadcast %57 : vector<1x128xf32> to vector<16x128xf32>
    %103 = arith.minimumf %101, %102 : vector<16x128xf32>
    %104 = arith.subf %100, %103 : vector<16x128xf32>
    %105 = arith.mulf %97, %104 : vector<16x128xf32>
    %106 = arith.subf %105, %88 : vector<16x128xf32>
    %107 = tpu.reciprocal %105 {approx = true} : vector<16x128xf32> -> vector<16x128xf32>
    %108 = arith.mulf %106, %107 : vector<16x128xf32>
    %109 = arith.subf %90, %108 : vector<16x128xf32>
    %110 = arith.addf %51, %22 : vector<16x128xf32>
    %cst_14 = arith.constant 2.000000e+00 : f32
    %111 = vector.broadcast %cst_14 : f32 to vector<16x128xf32>
    %112 = arith.mulf %111, %109 : vector<16x128xf32>
    %113 = arith.subf %110, %112 : vector<16x128xf32>
    %c0_15 = arith.constant 0 : index
    %c0_16 = arith.constant 0 : index
    %114 = vector.load %arg5[%c0_15, %c0_16] : memref<16x128xf32, #tpu.memory_space<vmem>>, vector<16x128xf32>
    tpu.vector_store %arg5[%c0_15, %c0_16], %113 {strides = array<i32>} : memref<16x128xf32, #tpu.memory_space<vmem>>, vector<16x128xf32>,
    return
  }
  func.func @transform_0(%arg0: i32) -> (i32, i32) {
    %c0_i32 = arith.constant 0 : i32
    %c0_i32_0 = arith.constant 0 : i32
    return %arg0, %c0_i32 : i32, i32
  }
  func.func @transform_1(%arg0: i32) -> (i32, i32) {
    %c0_i32 = arith.constant 0 : i32
    %c0_i32_0 = arith.constant 0 : i32
    return %arg0, %c0_i32 : i32, i32
  }
  func.func @transform_2(%arg0: i32) -> (i32, i32) {
    %c0_i32 = arith.constant 0 : i32
    %c0_i32_0 = arith.constant 0 : i32
    %c0_i32_1 = arith.constant 0 : i32
    return %c0_i32, %c0_i32_0 : i32, i32
  }
  func.func @transform_3(%arg0: i32) -> (i32, i32) {
    %c0_i32 = arith.constant 0 : i32
    %c0_i32_0 = arith.constant 0 : i32
    %c0_i32_1 = arith.constant 0 : i32
    return %c0_i32, %c0_i32_0 : i32, i32
  }
  func.func @transform_4(%arg0: i32) -> (i32, i32) {
    %c0_i32 = arith.constant 0 : i32
    %c0_i32_0 = arith.constant 0 : i32
    return %arg0, %c0_i32 : i32, i32
  }
}

</mosaic_0001>

<bundles_post_ra>
// kernel: matcher_cost_matrix.1
= control target key start
LH: loop header
LB: loop body
LE: loop exit
PB: predicated region body
PF: predicated region fallthrough
CT: control target
= control target key end

     0   :  { %s731_s15 = smov 0   ;;  %s810_s0 = inlined_call_operand.vmem [shape: bf16[32,16], index: 0, kind: input, shape index: {}]   ;;  %s811_s1 = inlined_call_operand.vmem [shape: f32[32,8], index: 1, kind: input, shape index: {}]   ;;  %s812_s2 = inlined_call_operand.vmem [shape: bf16[16,128], index: 2, kind: input, shape index: {}]   ;;  %s813_s3 = inlined_call_operand.vmem [shape: f32[8,128], index: 3, kind: input, shape index: {}]   ;;  %s814_s4 = inlined_call_operand.vmem [shape: f32[32,128], index: 4, kind: output, shape index: {}]  }
   0x1 LB: > { %s603_s16 = sadd.s32 4294967295, %s692_s15   ;;  %p607_p0 = scmp.ge.s32.totalorder %s692_s15, 1  ;;  %s692_s15 = sphi %s731_s15, %s14_s15  }
   0x2   : > { %p174_p1 = scmp.lt.s32.totalorder %s692_s15, 3 }
   0x4   : > { %p175_p2 = pnand %p607_p0, %p174_p1 }
   0x5   : > { %s608_s17 = sshll.u32 (!%p175_p2), %s603_s16, 1  ;;  %v664_v0 = vld [vmem:[%s812_s2] sm:$0xff] (!%p175_p2)   ;;  %v694_v1 = vmov (!%p175_p2), 0.0   ;;  %vm695_vm0 = vmmov (!%p175_p2), 0   ;;  %v696_v2 = vmov (!%p175_p2), 5   ;;  %v697_v3 = vmov (!%p175_p2), 4  }
   0x6   : > { %178 = sbr.rel (%p175_p2) target bundleno = 409 (0x199), region = 36  ;;  %p206_p3 = scmp.lt.s32.totalorder (!%p175_p2), %s608_s17, 3  ;;  %621 = vmatprep.subr.bf16.mxu0 (!%p175_p2), %v694_v1  ;;  %623 = vmatprep.mubr.msk.bf16.mxu0 (!%p175_p2), %vm695_vm0, %v694_v1  ;;  %vm239_vm1 = vcmask (!%p175_p2), 130048   ;;  %v699_v7 = vmov (!%p175_p2), 7   ;;  %v700_v8 = vmov (!%p175_p2), 6   ;;  %v702_v13 = vmov (!%p175_p2), 0  }
   0x7   : > { %622 = vmatpush3.bf16.msra.mxu0 (!%p175_p2), %v664_v0  ;;  %649 = vset.pattern.permute.xlu0 (!%p175_p2), %v696_v2  ;;  %s698_s28 = smov (!%p175_p2), 2   ;;  %s701_s29 = smov (!%p175_p2), 127   ;;  %v703_v14 = vmov (!%p175_p2), 1   ;;  %v704_v23 = vmov (!%p175_p2), 2   ;;  %v705_v24 = vmov (!%p175_p2), 3   ;;  %v329_v31 = vlaneseq (!%p175_p2)  ;;  %v765_v35 = vld [vmem:[%s813_s3] sm:$0xff] (!%p175_p2) }
   0x8   : > { %647 = vset.pattern.permute.xlu1 (!%p175_p2), %v697_v3  ;;  %v410_v37 = vrot.slane (!%p175_p2), %v765_v35, 6 }
   0x9   : > { %v760_v34 = vshrl.u32 (!%p175_p2), %v329_v31, 7 }
   0xa   : > { %v412_v44 = vsub.f32 (!%p175_p2), %v765_v35, %v410_v37 }
   0xb   : > { %v441_v38 = vsub.s32 (!%p175_p2), 4, %v760_v34  ;;  %v427_v39 = vsub.s32 (!%p175_p2), 6, %v760_v34  ;;  %v473_v41 = vsub.s32 (!%p175_p2), 5, %v760_v34  ;;  %v459_v42 = vsub.s32 (!%p175_p2), 7, %v760_v34 }
   0xc   : > { %v414_v53 = vrot.slane (!%p175_p2), %v412_v44, 1 }
   0xd   : > { %s816_s17 = smov (!%p206_p3, %s608_s17), 3  ;;  %v442_v45 = vrot.slane %v765_v35, %v441_v38  ;;  %v428_v46 = vrot.slane %v765_v35, %v427_v39  ;;  %v474_v49 = vrot.slane %v765_v35, %v473_v41  ;;  %v460_v50 = vrot.slane %v765_v35, %v459_v42 }
   0xe   : > { %s611_s20 = sshll.u32 %s816_s17, 3  ;;  %s609_s21 = sshll.u32 %s816_s17, 2  ;;  %v416_v63 = vmul.f32 %v414_v53, %v412_v44 }
   0xf   : > { %s215_s24 = scalar_lea.vmem %s811_s1, %s611_s20  ;;  %s209_s27 = scalar_lea.vmem %s810_s0, %s609_s21 }
  0x10   : > { %v316_v4 = vld [vmem:[%s215_s24] sm:$0xff]  ;;  %v317_v6 = vld [vmem:[%s215_s24 + $0x8] sm:$0xff]  ;;  %s221_s8 = scalar_lea.vmem %s814_s4, %s611_s20 }
  0x11   : > { %391 = vrot.lane.b32.xlu0 %v316_v4, %s698_s28  ;;  %v665_v5 = vld [vmem:[%s209_s27] sm:$0xff]  }
  0x12   : > { %624 = vmatmul.mubr.msk.bf16.vlgmr.msra.gmra.mrb[0].mxu0 %vm239_vm1, %v665_v5 }
  0x15   : > { %393 = vrot.lane.b32.xlu0 %v317_v6, %s698_s28 }
  0x19   : > { %464 = vperm.xlu0 %649, %v316_v4  }
  0x1d   : > { %652 = vset.pattern.permute.xlu0 %v699_v7 }
  0x1e   : > { %454 = vperm.xlu0 %652, %v317_v6  }
  0x22   : > { %653 = vset.pattern.permute.xlu0 %v700_v8 }
  0x23   : > { %418 = vperm.xlu0 %653, %v316_v4  }
  0x83   : > { %v392_v9 = vpop.permute.xlu0 %391 }
  0x84   : > { %v397_v10 = vsub.f32 %v316_v4, %v392_v9  ;;  %v496_v9 = vrot.slane %v416_v63, %v427_v39 }
  0x86   : > { %401 = vrot.lane.b32.xlu1 %v397_v10, %s701_s29 }
  0x87   : > { %v394_v11 = vpop.permute.xlu0 %393 }
  0x88   : > { %v398_v12 = vsub.f32 %v317_v6, %v394_v11 }
  0x8a   : > { %403 = vrot.lane.b32.xlu1 %v398_v12, %s701_s29 }
  0x8e   : > { %432 = vperm.xlu1 %647, %v316_v4  }
  0x92   : > { %648 = vset.pattern.permute.xlu1 %v699_v7 }
  0x93   : > { %450 = vperm.xlu1 %648, %v316_v4  }
  0x97   : > { %650 = vset.pattern.permute.xlu1 %v700_v8 }
  0x98   : > { %422 = vperm.xlu1 %650, %v317_v6   ;;  %v465_v32 = vpop.permute.xlu0 %464 }
  0x99   : > { %v475_v57 = vmax.f32 %v465_v32, %v474_v49  ;;  %v513_v59 = vmin.f32 %v465_v32, %v474_v49 }
  0x9c   : > { %651 = vset.pattern.permute.xlu1 %v697_v3 }
  0x9d   : > { %436 = vperm.xlu1 %651, %v317_v6   ;;  %v455_v36 = vpop.permute.xlu0 %454 }
  0x9e   : > { %v462_v0 = vmin.f32 %v455_v36, %v460_v50  ;;  %v512_v7 = vmax.f32 %v455_v36, %v460_v50 }
  0xa1   : > { %654 = vset.pattern.permute.xlu1 %v696_v2 }
  0xa2   : > { %468 = vperm.xlu1 %654, %v317_v6   ;;  %v419_v51 = vpop.permute.xlu0 %418 }
  0xa3   : > { %v429_v56 = vmin.f32 %v419_v51, %v428_v46  ;;  %v505_v62 = vmax.f32 %v419_v51, %v428_v46 }
  0xa6   : > { %655 = vset.pattern.permute.xlu1 %v702_v13 }
  0xa7   : > { %321 = vperm.xlu1 %655, %v316_v4  }
  0xab   : > { %656 = vset.pattern.permute.xlu1 %v703_v14 }
  0xac   : > { %338 = vperm.xlu1 %656, %v316_v4  }
  0xb0   : > { %657 = vset.pattern.permute.xlu1 %v700_v8 }
  0xe5   : > { %v754_v15 = vpop.f32.mrb[0].mxu0 }
  0xe6   : > { %v625_v16 = vpop.f32.mrb[1].mxu0  ;;  %v284_v26 = vsub.f32 0.0, %v754_v15 }
  0xe7   : > { %v756_v17 = vpop.f32.mrb[2].mxu0 }
  0xe8   : > { %v626_v18 = vpop.f32.mrb[3].mxu0  ;;  %v285_v27 = vsub.f32 0.0, %v756_v17  ;;  %v286_v28 = vmul.f32 1.442695, %v284_v26 }
  0xea   : > { %v288_v30 = vmul.f32 1.442695, %v285_v27  ;;  %666 = vpow2.f32 %v286_v28 }
  0xec   : > { %668 = vpow2.f32 %v288_v30 }
  0xf4   : > { %v667_v43 = vpop.eup %666 }
  0xf5   : > { %v290_v48 = vadd.f32 1.0, %v667_v43 }
  0xf6   : > { %v775_v47 = vpop.eup %668 }
  0xf7   : > { %v291_v54 = vadd.f32 1.0, %v775_v47  ;;  %670 = vrcp.f32 %v290_v48 }
  0xf8   : > { %v402_v19 = vpop.permute.xlu1 %401  ;;  %672 = vlog2.f32 %v290_v48 }
  0xf9   : > { %v407_v20 = vmul.f32 %v402_v19, %v397_v10  ;;  %674 = vrcp.f32 %v291_v54 }
  0xfa   : > { %676 = vlog2.f32 %v291_v54 }
  0xfb   : > { %485 = vperm.xlu1 %657, %v407_v20  }
  0xfc   : > { %v404_v21 = vpop.permute.xlu1 %403 }
  0xfd   : > { %v408_v22 = vmul.f32 %v404_v21, %v398_v12 }
  0xff   : > { %659 = vset.pattern.permute.xlu1 %v703_v14  ;;  %490 = vperm.xlu0 %653, %v408_v22   ;;  %v331_v22 = vsub.s32 0, %v760_v34 }
 0x100   : > { %342 = vperm.xlu1 %659, %v317_v6  }
 0x101   : > { %v671_v21 = vpop.eup %670  ;;  %v332_v37 = vrot.slane %v765_v35, %v331_v22 }
 0x102   : > { %v673_v28 = vpop.eup %672  ;;  %v298_v36 = vmul.f32 %v671_v21, %v667_v43 }
 0x103   : > { %658 = vset.pattern.permute.xlu0 %v702_v13 }
 0x104   : > { %660 = vset.pattern.permute.xlu1 %v704_v23  ;;  %326 = vperm.xlu0 %658, %v317_v6   ;;  %v300_v43 = vmul.f32 %v298_v36, %v298_v36 }
 0x105   : > { %356 = vperm.xlu1 %660, %v316_v4  }
 0x108   : > { %661 = vset.pattern.permute.xlu0 %v704_v23  ;;  %v347_v23 = vsub.s32 1, %v760_v34 }
 0x109   : > { %662 = vset.pattern.permute.xlu1 %v705_v24  ;;  %360 = vperm.xlu0 %661, %v317_v6  }
 0x10a   : > { %374 = vperm.xlu1 %662, %v316_v4   ;;  %v348_v38 = vrot.slane %v765_v35, %v347_v23 }
 0x10d   : > { %663 = vset.pattern.permute.xlu0 %v700_v8  ;;  %v433_v25 = vpop.permute.xlu1 %432 }
 0x10e   : > { %378 = vperm.xlu1 %662, %v317_v6   ;;  %v443_v55 = vmax.f32 %v433_v25, %v442_v45  ;;  %v507_v61 = vmin.f32 %v433_v25, %v442_v45 }
 0x110   : > { %v445_v2 = vsub.f32 %v429_v56, %v443_v55  ;;  %v509_v8 = vsub.f32 %v505_v62, %v507_v61  ;;  %v383_v56 = vsub.s32 3, %v760_v34  ;;  %v302_v61 = vmul.f32 0.5, %v300_v43 }
 0x112   : > { %v451_v29 = vpop.permute.xlu1 %450  ;;  %v447_v18 = vmax.f32 %v445_v2, 0.0 }
 0x113   : > { %v461_v58 = vmin.f32 %v451_v29, %v460_v50  ;;  %v511_v1 = vmax.f32 %v451_v29, %v460_v50  ;;  %v295_v50 = vmul.f32 0.6931472, %v673_v28 }
 0x115   : > { %v477_v3 = vsub.f32 %v461_v58, %v475_v57  ;;  %v515_v10 = vsub.f32 %v511_v1, %v513_v59  ;;  %v310_v62 = vadd.f32 %v295_v50, %v754_v15 }
 0x117   : > { %v423_v33 = vpop.permute.xlu1 %422  ;;  %v479_v16 = vmax.f32 %v477_v3, 0.0  ;;  %v784_v24 = vmul.f32 %v515_v10, %v509_v8  ;;  %v304_v8 = vmul.f32 %v302_v61, %v295_v50 }
 0x118   : > { %v430_v4 = vmin.f32 %v423_v33, %v428_v46  ;;  %v506_v11 = vmax.f32 %v423_v33, %v428_v46  ;;  %v675_v33 = vpop.eup %674 }
 0x119   : > { %v481_v31 = vmul.f32 %v479_v16, %v447_v18  ;;  %678 = vrcp.f32 %v784_v24  ;;  %v677_v44 = vpop.eup %676  ;;  %v299_v51 = vmul.f32 %v675_v33, %v775_v47  ;;  %v307_v58 = vmul.f32 %v675_v33, %v675_v33 }
 0x11a   : > { %v297_v63 = vmul.f32 0.6931472, %v677_v44 }
 0x11c   : > { %v437_v40 = vpop.permute.xlu1 %436  ;;  %v311_v10 = vadd.f32 %v297_v63, %v756_v17 }
 0x11d   : > { %v444_v5 = vmax.f32 %v437_v40, %v442_v45  ;;  %v508_v12 = vmin.f32 %v437_v40, %v442_v45  ;;  %v365_v40 = vsub.s32 2, %v760_v34  ;;  %v306_v45 = vmul.f32 %v671_v21, %v671_v21 }
 0x11f   : > { %v446_v19 = vsub.f32 %v430_v4, %v444_v5  ;;  %v510_v25 = vsub.f32 %v506_v11, %v508_v12  ;;  %v366_v55 = vrot.slane %v765_v35, %v365_v40  ;;  %v308_v57 = vmul.f32 1.5, %v306_v45 }
 0x120   : > { %v384_v5 = vrot.slane %v765_v35, %v383_v56 }
 0x121   : > { %v469_v52 = vpop.permute.xlu1 %468  ;;  %v448_v29 = vmax.f32 %v446_v19, 0.0 }
 0x122   : > { %v476_v6 = vmax.f32 %v469_v52, %v474_v49  ;;  %v514_v13 = vmin.f32 %v469_v52, %v474_v49 }
 0x124   : > { %v478_v20 = vsub.f32 %v462_v0, %v476_v6  ;;  %v516_v26 = vsub.f32 %v512_v7, %v514_v13  ;;  %v301_v0 = vmul.f32 %v299_v51, %v299_v51  ;;  %v309_v6 = vmul.f32 1.5, %v307_v58  ;;  %v679_v7 = vpop.eup %678 }
 0x126   : > { %v780_v60 = vpop.permute.xlu1 %321  ;;  %v480_v30 = vmax.f32 %v478_v20, 0.0  ;;  %v790_v41 = vmul.f32 %v516_v26, %v510_v25  ;;  %v303_v13 = vmul.f32 0.5, %v301_v0 }
 0x127   : > { %v333_v52 = vsub.f32 %v780_v60, %v332_v37 }
 0x128   : > { %v482_v46 = vmul.f32 %v480_v30, %v448_v29  ;;  %v305_v30 = vmul.f32 %v303_v13, %v297_v63 }
 0x129   : > { %v335_v1 = vand.u32 2147483647, %v333_v52 }
 0x12b   : > { %v339_v14 = vpop.permute.xlu1 %338 }
 0x12c   : > { %v349_v53 = vsub.f32 %v339_v14, %v348_v38 }
 0x12e   : > { %v351_v60 = vand.u32 2147483647, %v349_v53 }
 0x130   : > { %v353_v14 = vadd.f32 %v351_v60, %v335_v1 }
 0x17a   : > { %v486_v27 = vpop.permute.xlu1 %485 }
 0x17b   : > { %v497_v32 = vadd.f32 %v496_v9, %v486_v27 }
 0x17d   : > { %v499_v39 = vsub.f32 %v497_v32, %v481_v31  ;;  %v313_v32 = vmul.f32 %v311_v10, %v309_v6 }
 0x17e   : > { %v491_v42 = vpop.permute.xlu0 %490 }
 0x17f   : > { %680 = vrcp.f32 %v499_v39  ;;  %v498_v48 = vadd.f32 %v496_v9, %v491_v42  ;;  %v343_v49 = vpop.permute.xlu1 %342  ;;  %v519_v4 = vsub.f32 %v784_v24, %v499_v39  ;;  %v312_v9 = vmul.f32 %v310_v62, %v308_v57 }
 0x180   : > { %682 = vrcp.f32 %v790_v41  ;;  %v350_v34 = vsub.f32 %v343_v49, %v348_v38 }
 0x181   : > { %v500_v54 = vsub.f32 %v498_v48, %v482_v46  ;;  %v523_v21 = vmul.f32 %v679_v7, %v519_v4  ;;  %v314_v29 = vsub.f32 %v304_v8, %v312_v9  ;;  %v315_v48 = vsub.f32 %v305_v30, %v313_v32 }
 0x182   : > { %v352_v23 = vand.u32 2147483647, %v350_v34 }
 0x183   : > { %684 = vrcp.f32 %v500_v54  ;;  %v327_v59 = vpop.permute.xlu0 %326  ;;  %v520_v22 = vsub.f32 %v790_v41, %v500_v54 }
 0x184   : > { %v357_v47 = vpop.permute.xlu1 %356  ;;  %v334_v2 = vsub.f32 %v327_v59, %v332_v37 }
 0x185   : > { %v367_v3 = vsub.f32 %v357_v47, %v366_v55 }
 0x186   : > { %v336_v16 = vand.u32 2147483647, %v334_v2 }
 0x187   : > { %v369_v11 = vand.u32 2147483647, %v367_v3 }
 0x188   : > { %v361_v15 = vpop.permute.xlu0 %360  ;;  %v354_v33 = vadd.f32 %v352_v23, %v336_v16 }
 0x189   : > { %v681_v12 = vpop.eup %680  ;;  %v368_v18 = vsub.f32 %v361_v15, %v366_v55  ;;  %v375_v19 = vpop.permute.xlu1 %374  ;;  %v371_v27 = vadd.f32 %v369_v11, %v353_v14 }
 0x18a   : > { %v503_v20 = vmul.f32 %v681_v12, %v481_v31  ;;  %v385_v35 = vsub.f32 %v375_v19, %v384_v5  ;;  %v683_v25 = vpop.eup %682 }
 0x18b   : > { %v370_v24 = vand.u32 2147483647, %v368_v18  ;;  %v524_v38 = vmul.f32 %v683_v25, %v520_v22 }
 0x18c   : > { %v525_v26 = vsub.f32 %v503_v20, %v523_v21  ;;  %v387_v28 = vand.u32 2147483647, %v385_v35 }
 0x18d   : > { %v685_v17 = vpop.eup %684  ;;  %v379_v36 = vpop.permute.xlu1 %378  ;;  %v372_v40 = vadd.f32 %v370_v24, %v354_v33 }
 0x18e   : > { %v504_v37 = vmul.f32 %v685_v17, %v482_v46  ;;  %v389_v31 = vadd.f32 %v387_v28, %v371_v27  ;;  %v386_v39 = vsub.f32 %v379_v36, %v384_v5  ;;  %v529_v44 = vmul.f32 2.0, %v525_v26 }
 0x190   : > { %v526_v41 = vsub.f32 %v504_v37, %v524_v38  ;;  %v527_v42 = vadd.f32 %v389_v31, %v314_v29  ;;  %v388_v45 = vand.u32 2147483647, %v386_v39 }
 0x192   : > { %v531_v49 = vsub.f32 %v527_v42, %v529_v44  ;;  %v390_v50 = vadd.f32 %v388_v45, %v372_v40  ;;  %v530_v51 = vmul.f32 2.0, %v526_v41 }
 0x194   : > { %533 = vst [vmem:[%s221_s8] sm:$0xff] %v531_v49  ;;  %v528_v43 = vadd.f32 %v390_v50, %v315_v48 }
 0x196   : > { %v532_v46 = vsub.f32 %v528_v43, %v530_v51 }
 0x198   : > { %534 = vst [vmem:[%s221_s8 + $0x8] sm:$0xff] %v532_v46 }
 0x199 PF: > { %s14_s15 = sadd.s32 1, %s692_s15  }
 0x19a   : > { %p11_p4 = scmp.ge.s32.totalorder %s14_s15, 4  }
 0x19c   :  { %13 = sbr.rel (!%p11_p4) target bundleno = 1 (0x1), region = 69 }

</bundles_post_ra>
